<compile_context>
chip_gen: v5e
topology: v5e:2x2
jax: 0.10.0
libtpu: 0.0.40
codegen_flags: <defaults>
</compile_context>

<pallas_src>
import functools

import jax
import jax.numpy as jnp
from jax.experimental import pallas as pl
from jax.experimental.pallas import tpu as pltpu


def _round_up(x, m):
    return ((x + m - 1) // m) * m


def _fused_kernel(x_ref, w_ref, out_ref, *, num_cate, off_title, off_price,
                  off_brand, emb_dim, k_pad):
    xv = x_ref[...]                                                # (TB, 3+num_cate) int32
    tb = xv.shape[0]
    col = jax.lax.broadcasted_iota(jnp.int32, (tb, k_pad), 1)

    # cate feature values pass through into columns [0, num_cate) of the
    # lane-dense LHS slab (built in-registers, no HBM slab, no concatenates).
    lhs = jnp.zeros((tb, k_pad), jnp.float32)
    for j in range(num_cate):
        val = xv[:, 3 + j:4 + j].astype(jnp.float32)               # (TB, 1)
        lhs = lhs + jnp.where(col == j, val, jnp.float32(0.0))

    # title/price/brand one-hots at their diagonal-block offsets, fused into a
    # single mask -> single int->f32 convert, single add.
    # (Out-of-range / negative indices would silently land in another block;
    #  inputs are assumed validated, matching nn.Embedding's contract.)
    t = xv[:, 0:1] + off_title
    p = xv[:, 1:2] + off_price
    b = xv[:, 2:3] + off_brand
    mask = (col == t) | (col == p) | (col == b)
    lhs = lhs + mask.astype(jnp.float32)

    # Single MXU matmul against the block-diagonal fused weight; HIGHEST keeps
    # the f32 table rows exact (no bf16 demotion on any generation).
    acc = jnp.dot(lhs, w_ref[...], preferred_element_type=jnp.float32,
                  precision=jax.lax.Precision.HIGHEST)

    # sigmoid only on the cate-linear slice (first emb_dim output columns).
    ocol = jax.lax.broadcasted_iota(jnp.int32, acc.shape, 1)
    out_ref[...] = jnp.where(ocol < emb_dim, jax.nn.sigmoid(acc), acc)


def make_fused_weight(w_cate, title_tbl, price_tbl, brand_tbl):
    """Build the block-diagonal fused weight ONCE (parameter-load time).

    Layout (K_pad, OUT_pad):
        [ W_cate^T   0        0        0       ]
        [ 0          T_title  0        0       ]
        [ 0          0        T_price  0       ]
        [ 0          0        0        T_brand ]
    """
    D, num_cate = w_cate.shape
    num_title, num_price, num_brand = (title_tbl.shape[0], price_tbl.shape[0],
                                       brand_tbl.shape[0])
    k_total = num_cate + num_title + num_price + num_brand
    k_pad = _round_up(k_total, 128)          # minimal lane-dense contraction dim
    out_pad = _round_up(4 * D, 128)          # minimal lane-dense output width

    w_big = jnp.zeros((k_pad, out_pad), jnp.float32)
    r = 0
    w_big = w_big.at[r:r + num_cate, 0 * D:1 * D].set(w_cate.T.astype(jnp.float32)); r += num_cate
    w_big = w_big.at[r:r + num_title, 1 * D:2 * D].set(title_tbl.astype(jnp.float32)); r += num_title
    w_big = w_big.at[r:r + num_price, 2 * D:3 * D].set(price_tbl.astype(jnp.float32)); r += num_price
    w_big = w_big.at[r:r + num_brand, 3 * D:4 * D].set(brand_tbl.astype(jnp.float32))
    return w_big


def _pick_tile(batch, block_b):
    # TB multiple of 8; cap so big batches give >= 2 grid blocks (keeps both
    # v7x TensorCores busy) while small batches stay a single full block.
    half = _round_up(max(1, -(-batch // 2)), 8)
    tb = min(block_b, max(8, half))
    b_pad = _round_up(batch, tb)
    return tb, b_pad


def amazon_item_forward(x, fused_w, *, num_cate, num_title, num_price,
                        emb_dim, block_b=512):
    """x: (B, 3 + num_cate) int. fused_w: output of make_fused_weight.
    Returns (B, 4*emb_dim) float32."""
    B = x.shape[0]
    n_feat = x.shape[1]                      # 3 + num_cate
    k_pad, out_pad = fused_w.shape

    tb, b_pad = _pick_tile(B, block_b)
    n_blocks = b_pad // tb

    x_i32 = x.astype(jnp.int32)
    if b_pad != B:
        x_i32 = jnp.pad(x_i32, ((0, b_pad - B), (0, 0)))   # pad rows discarded later

    kernel = functools.partial(
        _fused_kernel,
        num_cate=num_cate,
        off_title=num_cate,
        off_price=num_cate + num_title,
        off_brand=num_cate + num_title + num_price,
        emb_dim=emb_dim,
        k_pad=k_pad,
    )

    out = pl.pallas_call(
        kernel,
        out_shape=jax.ShapeDtypeStruct((b_pad, out_pad), jnp.float32),
        grid=(n_blocks,),
        in_specs=[
            pl.BlockSpec((tb, n_feat), lambda i: (i, 0)),          # raw int features
            pl.BlockSpec((k_pad, out_pad), lambda i: (0, 0)),      # fused weight (resident)
        ],
        out_specs=pl.BlockSpec((tb, out_pad), lambda i: (i, 0)),
        compiler_params=pltpu.CompilerParams(
            dimension_semantics=("parallel",),
            vmem_limit_bytes=32 * 1024 * 1024,
        ),
    )(x_i32, fused_w)

    return out[:B, :4 * emb_dim]


if __name__ == "__main__":
    # config (small shapes consistent with the module)
    num_cate, num_title, num_price, num_brand, D = 12, 20, 10, 15, 16
    B = 8

    key = jax.random.PRNGKey(0)
    k_w, k_t, k_p, k_b, k_idx, k_cate = jax.random.split(key, 6)

    # parameters (mirroring module __init__ shapes)
    w_cate = jax.random.normal(k_w, (D, num_cate), jnp.float32) * 0.1   # nn.Linear weight (out, in)
    title_tbl = jax.random.normal(k_t, (num_title, D), jnp.float32)
    price_tbl = jax.random.normal(k_p, (num_price, D), jnp.float32)
    brand_tbl = jax.random.normal(k_b, (num_brand, D), jnp.float32)

    # fused block-diagonal weight built ONCE (not per forward call)
    fused_w = make_fused_weight(w_cate, title_tbl, price_tbl, brand_tbl)
    fused_w = jax.block_until_ready(fused_w)

    # input x: (B, 3 + num_cate) int32
    title_idx = jax.random.randint(k_idx, (B, 1), 0, num_title)
    price_idx = jax.random.randint(jax.random.fold_in(k_idx, 1), (B, 1), 0, num_price)
    brand_idx = jax.random.randint(jax.random.fold_in(k_idx, 2), (B, 1), 0, num_brand)
    cate_multi_hot = jax.random.bernoulli(k_cate, 0.3, (B, num_cate)).astype(jnp.int32)
    x = jnp.concatenate([title_idx, price_idx, brand_idx, cate_multi_hot], axis=1).astype(jnp.int32)

    out = amazon_item_forward(x, fused_w, num_cate=num_cate, num_title=num_title,
                              num_price=num_price, emb_dim=D)
    out = jax.block_until_ready(out)

    # pure-JAX reference check (mirrors the PyTorch forward)
    ref = jnp.concatenate(
        [
            jax.nn.sigmoid(x[:, 3:].astype(jnp.float32) @ w_cate.T),
            title_tbl[x[:, 0]],
            price_tbl[x[:, 1]],
            brand_tbl[x[:, 2]],
        ],
        axis=1,
    )
    assert out.shape == (B, 4 * D) and out.dtype == jnp.float32
    assert jnp.allclose(out, ref, atol=1e-5), "mismatch vs reference"

    print("KERNEL_OK")
</pallas_src>

<mosaic_0001>
module attributes {stable_mosaic.version = 11 : i64} {
  func.func @_fused_kernel(%arg0: i32, %arg1: memref<8x15xi32, #tpu.memory_space<vmem>>, %arg2: memref<128x128xf32, #tpu.memory_space<vmem>>, %arg3: memref<8x128xf32, #tpu.memory_space<vmem>>) attributes {dimension_semantics = [#tpu.dimension_semantics<parallel>], iteration_bounds = array<i64: 1>, scalar_prefetch = 0 : i64, scratch_operands = 0 : i64, tpu.core_type = #tpu.core_type<tc>, window_params = [{transform_indices = @transform_0, window_bounds = array<i64: 8, 15>}, {pipeline_mode = #tpu.pipeline_mode<synchronous>, transform_indices = @transform_1, window_bounds = array<i64: 128, 128>}, {transform_indices = @transform_2, window_bounds = array<i64: 8, 128>}]} {
    %c0 = arith.constant 0 : index
    %c0_0 = arith.constant 0 : index
    %0 = vector.load %arg1[%c0, %c0_0] : memref<8x15xi32, #tpu.memory_space<vmem>>, vector<8x15xi32>
    %1 = tpu.iota {dimensions = array<i32: 1>} : vector<8x128xi32>
    %cst = arith.constant 0.000000e+00 : f32
    %2 = vector.broadcast %cst : f32 to vector<8x128xf32>
    %3 = vector.extract_strided_slice %0 {offsets = [0, 3], sizes = [8, 1], strides = [1, 1]} : vector<8x15xi32> to vector<8x1xi32>
    %4 = arith.sitofp %3 : vector<8x1xi32> to vector<8x1xf32>
    %c0_i32 = arith.constant 0 : i32
    %5 = vector.broadcast %c0_i32 : i32 to vector<8x128xi32>
    %6 = arith.cmpi eq, %1, %5 : vector<8x128xi32>
    %cst_1 = arith.constant 0.000000e+00 : f32
    %7 = vector.shape_cast %4 : vector<8x1xf32> to vector<8x1xf32>
    %8 = vector.broadcast %7 : vector<8x1xf32> to vector<8x128xf32>
    %9 = vector.broadcast %cst_1 : f32 to vector<8x128xf32>
    %10 = arith.select %6, %8, %9 : vector<8x128xi1>, vector<8x128xf32>
    %11 = arith.addf %2, %10 : vector<8x128xf32>
    %12 = vector.extract_strided_slice %0 {offsets = [0, 4], sizes = [8, 1], strides = [1, 1]} : vector<8x15xi32> to vector<8x1xi32>
    %13 = arith.sitofp %12 : vector<8x1xi32> to vector<8x1xf32>
    %c1_i32 = arith.constant 1 : i32
    %14 = vector.broadcast %c1_i32 : i32 to vector<8x128xi32>
    %15 = arith.cmpi eq, %1, %14 : vector<8x128xi32>
    %cst_2 = arith.constant 0.000000e+00 : f32
    %16 = vector.shape_cast %13 : vector<8x1xf32> to vector<8x1xf32>
    %17 = vector.broadcast %16 : vector<8x1xf32> to vector<8x128xf32>
    %18 = vector.broadcast %cst_2 : f32 to vector<8x128xf32>
    %19 = arith.select %15, %17, %18 : vector<8x128xi1>, vector<8x128xf32>
    %20 = arith.addf %11, %19 : vector<8x128xf32>
    %21 = vector.extract_strided_slice %0 {offsets = [0, 5], sizes = [8, 1], strides = [1, 1]} : vector<8x15xi32> to vector<8x1xi32>
    %22 = arith.sitofp %21 : vector<8x1xi32> to vector<8x1xf32>
    %c2_i32 = arith.constant 2 : i32
    %23 = vector.broadcast %c2_i32 : i32 to vector<8x128xi32>
    %24 = arith.cmpi eq, %1, %23 : vector<8x128xi32>
    %cst_3 = arith.constant 0.000000e+00 : f32
    %25 = vector.shape_cast %22 : vector<8x1xf32> to vector<8x1xf32>
    %26 = vector.broadcast %25 : vector<8x1xf32> to vector<8x128xf32>
    %27 = vector.broadcast %cst_3 : f32 to vector<8x128xf32>
    %28 = arith.select %24, %26, %27 : vector<8x128xi1>, vector<8x128xf32>
    %29 = arith.addf %20, %28 : vector<8x128xf32>
    %30 = vector.extract_strided_slice %0 {offsets = [0, 6], sizes = [8, 1], strides = [1, 1]} : vector<8x15xi32> to vector<8x1xi32>
    %31 = arith.sitofp %30 : vector<8x1xi32> to vector<8x1xf32>
    %c3_i32 = arith.constant 3 : i32
    %32 = vector.broadcast %c3_i32 : i32 to vector<8x128xi32>
    %33 = arith.cmpi eq, %1, %32 : vector<8x128xi32>
    %cst_4 = arith.constant 0.000000e+00 : f32
    %34 = vector.shape_cast %31 : vector<8x1xf32> to vector<8x1xf32>
    %35 = vector.broadcast %34 : vector<8x1xf32> to vector<8x128xf32>
    %36 = vector.broadcast %cst_4 : f32 to vector<8x128xf32>
    %37 = arith.select %33, %35, %36 : vector<8x128xi1>, vector<8x128xf32>
    %38 = arith.addf %29, %37 : vector<8x128xf32>
    %39 = vector.extract_strided_slice %0 {offsets = [0, 7], sizes = [8, 1], strides = [1, 1]} : vector<8x15xi32> to vector<8x1xi32>
    %40 = arith.sitofp %39 : vector<8x1xi32> to vector<8x1xf32>
    %c4_i32 = arith.constant 4 : i32
    %41 = vector.broadcast %c4_i32 : i32 to vector<8x128xi32>
    %42 = arith.cmpi eq, %1, %41 : vector<8x128xi32>
    %cst_5 = arith.constant 0.000000e+00 : f32
    %43 = vector.shape_cast %40 : vector<8x1xf32> to vector<8x1xf32>
    %44 = vector.broadcast %43 : vector<8x1xf32> to vector<8x128xf32>
    %45 = vector.broadcast %cst_5 : f32 to vector<8x128xf32>
    %46 = arith.select %42, %44, %45 : vector<8x128xi1>, vector<8x128xf32>
    %47 = arith.addf %38, %46 : vector<8x128xf32>
    %48 = vector.extract_strided_slice %0 {offsets = [0, 8], sizes = [8, 1], strides = [1, 1]} : vector<8x15xi32> to vector<8x1xi32>
    %49 = arith.sitofp %48 : vector<8x1xi32> to vector<8x1xf32>
    %c5_i32 = arith.constant 5 : i32
    %50 = vector.broadcast %c5_i32 : i32 to vector<8x128xi32>
    %51 = arith.cmpi eq, %1, %50 : vector<8x128xi32>
    %cst_6 = arith.constant 0.000000e+00 : f32
    %52 = vector.shape_cast %49 : vector<8x1xf32> to vector<8x1xf32>
    %53 = vector.broadcast %52 : vector<8x1xf32> to vector<8x128xf32>
    %54 = vector.broadcast %cst_6 : f32 to vector<8x128xf32>
    %55 = arith.select %51, %53, %54 : vector<8x128xi1>, vector<8x128xf32>
    %56 = arith.addf %47, %55 : vector<8x128xf32>
    %57 = vector.extract_strided_slice %0 {offsets = [0, 9], sizes = [8, 1], strides = [1, 1]} : vector<8x15xi32> to vector<8x1xi32>
    %58 = arith.sitofp %57 : vector<8x1xi32> to vector<8x1xf32>
    %c6_i32 = arith.constant 6 : i32
    %59 = vector.broadcast %c6_i32 : i32 to vector<8x128xi32>
    %60 = arith.cmpi eq, %1, %59 : vector<8x128xi32>
    %cst_7 = arith.constant 0.000000e+00 : f32
    %61 = vector.shape_cast %58 : vector<8x1xf32> to vector<8x1xf32>
    %62 = vector.broadcast %61 : vector<8x1xf32> to vector<8x128xf32>
    %63 = vector.broadcast %cst_7 : f32 to vector<8x128xf32>
    %64 = arith.select %60, %62, %63 : vector<8x128xi1>, vector<8x128xf32>
    %65 = arith.addf %56, %64 : vector<8x128xf32>
    %66 = vector.extract_strided_slice %0 {offsets = [0, 10], sizes = [8, 1], strides = [1, 1]} : vector<8x15xi32> to vector<8x1xi32>
    %67 = arith.sitofp %66 : vector<8x1xi32> to vector<8x1xf32>
    %c7_i32 = arith.constant 7 : i32
    %68 = vector.broadcast %c7_i32 : i32 to vector<8x128xi32>
    %69 = arith.cmpi eq, %1, %68 : vector<8x128xi32>
    %cst_8 = arith.constant 0.000000e+00 : f32
    %70 = vector.shape_cast %67 : vector<8x1xf32> to vector<8x1xf32>
    %71 = vector.broadcast %70 : vector<8x1xf32> to vector<8x128xf32>
    %72 = vector.broadcast %cst_8 : f32 to vector<8x128xf32>
    %73 = arith.select %69, %71, %72 : vector<8x128xi1>, vector<8x128xf32>
    %74 = arith.addf %65, %73 : vector<8x128xf32>
    %75 = vector.extract_strided_slice %0 {offsets = [0, 11], sizes = [8, 1], strides = [1, 1]} : vector<8x15xi32> to vector<8x1xi32>
    %76 = arith.sitofp %75 : vector<8x1xi32> to vector<8x1xf32>
    %c8_i32 = arith.constant 8 : i32
    %77 = vector.broadcast %c8_i32 : i32 to vector<8x128xi32>
    %78 = arith.cmpi eq, %1, %77 : vector<8x128xi32>
    %cst_9 = arith.constant 0.000000e+00 : f32
    %79 = vector.shape_cast %76 : vector<8x1xf32> to vector<8x1xf32>
    %80 = vector.broadcast %79 : vector<8x1xf32> to vector<8x128xf32>
    %81 = vector.broadcast %cst_9 : f32 to vector<8x128xf32>
    %82 = arith.select %78, %80, %81 : vector<8x128xi1>, vector<8x128xf32>
    %83 = arith.addf %74, %82 : vector<8x128xf32>
    %84 = vector.extract_strided_slice %0 {offsets = [0, 12], sizes = [8, 1], strides = [1, 1]} : vector<8x15xi32> to vector<8x1xi32>
    %85 = arith.sitofp %84 : vector<8x1xi32> to vector<8x1xf32>
    %c9_i32 = arith.constant 9 : i32
    %86 = vector.broadcast %c9_i32 : i32 to vector<8x128xi32>
    %87 = arith.cmpi eq, %1, %86 : vector<8x128xi32>
    %cst_10 = arith.constant 0.000000e+00 : f32
    %88 = vector.shape_cast %85 : vector<8x1xf32> to vector<8x1xf32>
    %89 = vector.broadcast %88 : vector<8x1xf32> to vector<8x128xf32>
    %90 = vector.broadcast %cst_10 : f32 to vector<8x128xf32>
    %91 = arith.select %87, %89, %90 : vector<8x128xi1>, vector<8x128xf32>
    %92 = arith.addf %83, %91 : vector<8x128xf32>
    %93 = vector.extract_strided_slice %0 {offsets = [0, 13], sizes = [8, 1], strides = [1, 1]} : vector<8x15xi32> to vector<8x1xi32>
    %94 = arith.sitofp %93 : vector<8x1xi32> to vector<8x1xf32>
    %c10_i32 = arith.constant 10 : i32
    %95 = vector.broadcast %c10_i32 : i32 to vector<8x128xi32>
    %96 = arith.cmpi eq, %1, %95 : vector<8x128xi32>
    %cst_11 = arith.constant 0.000000e+00 : f32
    %97 = vector.shape_cast %94 : vector<8x1xf32> to vector<8x1xf32>
    %98 = vector.broadcast %97 : vector<8x1xf32> to vector<8x128xf32>
    %99 = vector.broadcast %cst_11 : f32 to vector<8x128xf32>
    %100 = arith.select %96, %98, %99 : vector<8x128xi1>, vector<8x128xf32>
    %101 = arith.addf %92, %100 : vector<8x128xf32>
    %102 = vector.extract_strided_slice %0 {offsets = [0, 14], sizes = [8, 1], strides = [1, 1]} : vector<8x15xi32> to vector<8x1xi32>
    %103 = arith.sitofp %102 : vector<8x1xi32> to vector<8x1xf32>
    %c11_i32 = arith.constant 11 : i32
    %104 = vector.broadcast %c11_i32 : i32 to vector<8x128xi32>
    %105 = arith.cmpi eq, %1, %104 : vector<8x128xi32>
    %cst_12 = arith.constant 0.000000e+00 : f32
    %106 = vector.shape_cast %103 : vector<8x1xf32> to vector<8x1xf32>
    %107 = vector.broadcast %106 : vector<8x1xf32> to vector<8x128xf32>
    %108 = vector.broadcast %cst_12 : f32 to vector<8x128xf32>
    %109 = arith.select %105, %107, %108 : vector<8x128xi1>, vector<8x128xf32>
    %110 = arith.addf %101, %109 : vector<8x128xf32>
    %111 = vector.extract_strided_slice %0 {offsets = [0, 0], sizes = [8, 1], strides = [1, 1]} : vector<8x15xi32> to vector<8x1xi32>
    %c12_i32 = arith.constant 12 : i32
    %112 = vector.broadcast %c12_i32 : i32 to vector<8x1xi32>
    %113 = arith.addi %111, %112 : vector<8x1xi32>
    %114 = vector.extract_strided_slice %0 {offsets = [0, 1], sizes = [8, 1], strides = [1, 1]} : vector<8x15xi32> to vector<8x1xi32>
    %c32_i32 = arith.constant 32 : i32
    %115 = vector.broadcast %c32_i32 : i32 to vector<8x1xi32>
    %116 = arith.addi %114, %115 : vector<8x1xi32>
    %117 = vector.extract_strided_slice %0 {offsets = [0, 2], sizes = [8, 1], strides = [1, 1]} : vector<8x15xi32> to vector<8x1xi32>
    %c42_i32 = arith.constant 42 : i32
    %118 = vector.broadcast %c42_i32 : i32 to vector<8x1xi32>
    %119 = arith.addi %117, %118 : vector<8x1xi32>
    %120 = vector.broadcast %113 : vector<8x1xi32> to vector<8x128xi32>
    %121 = arith.cmpi eq, %1, %120 : vector<8x128xi32>
    %122 = vector.broadcast %116 : vector<8x1xi32> to vector<8x128xi32>
    %123 = arith.cmpi eq, %1, %122 : vector<8x128xi32>
    %124 = arith.ori %121, %123 : vector<8x128xi1>
    %125 = vector.broadcast %119 : vector<8x1xi32> to vector<8x128xi32>
    %126 = arith.cmpi eq, %1, %125 : vector<8x128xi32>
    %127 = arith.ori %124, %126 : vector<8x128xi1>
    %128 = arith.extui %127 : vector<8x128xi1> to vector<8x128xi32>
    %129 = arith.sitofp %128 : vector<8x128xi32> to vector<8x128xf32>
    %130 = arith.addf %110, %129 : vector<8x128xf32>
    %c0_13 = arith.constant 0 : index
    %c0_14 = arith.constant 0 : index
    %131 = vector.load %arg2[%c0_13, %c0_14] : memref<128x128xf32, #tpu.memory_space<vmem>>, vector<128x128xf32>
    %cst_15 = arith.constant dense<0.000000e+00> : vector<8x128xf32>
    %132 = tpu.matmul %130, %131, %cst_15 {dimension_numbers = #tpu.dot_dimension_numbers<[1], [0], [0], [1], [0, 0, 1, 1], [], []>, precision = #tpu.contract_precision<fp32>} : vector<8x128xf32>, vector<128x128xf32>, vector<8x128xf32> -> vector<8x128xf32>
    %133 = tpu.iota {dimensions = array<i32: 1>} : vector<8x128xi32>
    %c16_i32 = arith.constant 16 : i32
    %134 = vector.broadcast %c16_i32 : i32 to vector<8x128xi32>
    %135 = arith.cmpi slt, %133, %134 : vector<8x128xi32>
    %136 = arith.negf %132 : vector<8x128xf32>
    %137 = math.exp %136 : vector<8x128xf32>
    %cst_16 = arith.constant 1.000000e+00 : f32
    %138 = vector.broadcast %cst_16 : f32 to vector<8x128xf32>
    %139 = arith.addf %138, %137 : vector<8x128xf32>
    %140 = arith.divf %138, %139 : vector<8x128xf32>
    %141 = arith.select %135, %140, %132 : vector<8x128xi1>, vector<8x128xf32>
    %c0_17 = arith.constant 0 : index
    %c0_18 = arith.constant 0 : index
    %142 = vector.load %arg3[%c0_17, %c0_18] : memref<8x128xf32, #tpu.memory_space<vmem>>, vector<8x128xf32>
    tpu.vector_store %arg3[%c0_17, %c0_18], %141 {strides = array<i32>} : memref<8x128xf32, #tpu.memory_space<vmem>>, vector<8x128xf32>,
    return
  }
  func.func @transform_0(%arg0: i32) -> (i32, i32) {
    %c0_i32 = arith.constant 0 : i32
    %c0_i32_0 = arith.constant 0 : i32
    return %arg0, %c0_i32 : i32, i32
  }
  func.func @transform_1(%arg0: i32) -> (i32, i32) {
    %c0_i32 = arith.constant 0 : i32
    %c0_i32_0 = arith.constant 0 : i32
    %c0_i32_1 = arith.constant 0 : i32
    return %c0_i32, %c0_i32_0 : i32, i32
  }
  func.func @transform_2(%arg0: i32) -> (i32, i32) {
    %c0_i32 = arith.constant 0 : i32
    %c0_i32_0 = arith.constant 0 : i32
    return %arg0, %c0_i32 : i32, i32
  }
}

</mosaic_0001>

<bundles_post_ra>
// kernel: tpu_custom_call.1
= control target key start
LH: loop header
LB: loop body
LE: loop exit
PB: predicated region body
PF: predicated region fallthrough
CT: control target
= control target key end

     0   :  { %7 = vsyncpa [#allocation3], 0  ;;  %s968_s0 = inlined_call_operand.hbm [shape: s32[8,15], index: 0, kind: input, shape index: {}]   ;;  %s969_s1 = inlined_call_operand.hbm [shape: f32[128,128], index: 1, kind: input, shape index: {}]   ;;  %s970_s2 = inlined_call_operand.hbm [shape: f32[8,128], index: 2, kind: output, shape index: {}]  }
   0x1   :  { %8 = vsyncpa [#allocation6], 0 }
   0x2   :  { %9 = vsyncpa [#allocation4], 0  ;;  %s15_s11 = sshll.u32 %s968_s0, 4  ;;  %s669_s12 = smov [#allocation2]   ;;  %s16_s11 = int_to_ptr.hbm [resolvable:$true] %s15_s11 }
   0x3   :  { %s17_s13 = sshll.u32 %s669_s12, 4  ;;  %s25_s16 = sshll.u32 %s969_s1, 4  ;;  %s18_s13 = int_to_ptr.vmem [resolvable:$true] %s17_s13  ;;  %s26_s16 = int_to_ptr.hbm [resolvable:$true] %s25_s16 }
   0x4   :  { %20 = dma.hbm_to_vmem [thread:$0]  %s16_s11, 128, %s18_s13, [#allocation3]  }
   0x5   :  { %s670_s17 = smov [#allocation5]   ;;  %s671_s19 = smov 128  }
   0x6   :  { %s27_s18 = sshll.u32 %s670_s17, 4  ;;  %s672_s20 = smov 8   ;;  %s28_s18 = int_to_ptr.vmem [resolvable:$true] %s27_s18 }
   0x7   :  { %33 = dma.hbm_to_vmem [thread:$0]  %s26_s16, 2048, %s28_s18, [#allocation6], %s671_s19, %s671_s19, %s672_s20  }
   0x8   :  { %663 = dma.done.wait [#allocation3], 128  }
   0x9   :  { %664 = vsyncadd [#allocation3], 4294967168 }
   0xa   :  { %665 = dma.done.wait [#allocation6], 2048  }
   0xb   :  { %666 = vsyncadd [#allocation6], 4294965248  ;;  %v673_v0 = vmov 5   ;;  %v674_v1 = vmov 3   ;;  %v675_v2 = vmov 7   ;;  %v42_v3 = vld [vmem:[#allocation2] sm:$0xff] }
   0xc   :  { %573 = vset.pattern.permute.xlu1 %v673_v0  ;;  %571 = vset.pattern.permute.xlu0 %v674_v1  ;;  %v45_v4 = vcvt.s32.f32 %v42_v3  ;;  %v676_v5 = vmov 6   ;;  %v677_v6 = vmov 4   ;;  %v678_v7 = vmov 8   ;;  %v166_v8 = vld [vmem:[#allocation5 + $0x78] sm:$0xff]  ;;  %v165_v26 = vld [vmem:[#allocation5 + $0x70] sm:$0xff]  ;;  %v164_v28 = vld [vmem:[#allocation5 + $0x68] sm:$0xff] }
   0xd   :  { %575 = vset.pattern.permute.xlu2 %v675_v2  ;;  %v711_v9 = vand.u32 4294901760, %v166_v8  ;;  %v679_v11 = vmov 9   ;;  %v680_v12 = vmov 11   ;;  %v681_v14 = vmov 10   ;;  %v163_v31 = vld [vmem:[#allocation5 + $0x60] sm:$0xff]  ;;  %v162_v35 = vld [vmem:[#allocation5 + $0x58] sm:$0xff] }
   0xe   :  { %63 = vperm.xlu1 %573, %v45_v4   ;;  %49 = vperm.xlu0 %571, %v45_v4   ;;  %v682_v17 = vmov 12   ;;  %v683_v18 = vmov 14   ;;  %v684_v19 = vmov 13   ;;  %v131_v20 = vadd.s32 12, %v42_v3  ;;  %v161_v40 = vld [vmem:[#allocation5 + $0x50] sm:$0xff]  ;;  %v160_v46 = vld [vmem:[#allocation5 + $0x48] sm:$0xff] }
   0xf   :  { %77 = vperm.xlu2 %575, %v45_v4   ;;  %v714_v10 = vsub.f32 %v166_v8, %v711_v9  ;;  %168 = vmatpush.msra.mxu0 %v711_v9  ;;  %v132_v21 = vadd.s32 32, %v42_v3  ;;  %v685_v22 = vmov 0   ;;  %v686_v23 = vmov 2   ;;  %v159_v52 = vld [vmem:[#allocation5 + $0x40] sm:$0xff]  ;;  %v158_v58 = vld [vmem:[#allocation5 + $0x38] sm:$0xff]  ;;  %v157_v0 = vld [vmem:[#allocation5 + $0x30] sm:$0xff] }
  0x10   :  { %364 = vmatpush.msra.mxu3 %v711_v9  ;;  %v687_v24 = vmov 1   ;;  %v133_v25 = vadd.s32 42, %v42_v3  ;;  %v723_v27 = vand.u32 4294901760, %v165_v26  ;;  %v728_v30 = vand.u32 4294901760, %v164_v28  ;;  %s689_s0 = smov [#allocation7]   ;;  %s537_s23 = sshll.u32 %s970_s2, 4  ;;  %s538_s23 = int_to_ptr.hbm [resolvable:$true] %s537_s23 }
  0x11   :  { %v210_v13 = vand.u32 4294901760, %v714_v10  ;;  %311 = vmatpush.msra.mxu2 %v714_v10  ;;  %v736_v34 = vand.u32 4294901760, %v163_v31  ;;  %v748_v39 = vand.u32 4294901760, %v162_v35  ;;  %v762_v45 = vand.u32 4294901760, %v161_v40  ;;  %s535_s1 = sshll.u32 %s689_s0, 4  ;;  %s536_s1 = int_to_ptr.vmem [resolvable:$true] %s535_s1 }
  0x12   :  { %v726_v29 = vsub.f32 %v165_v26, %v723_v27  ;;  %170 = vmatpush.msra.mxu0 %v723_v27  ;;  %366 = vmatpush.msra.mxu3 %v723_v27  ;;  %v734_v33 = vsub.f32 %v164_v28, %v728_v30  ;;  %v773_v51 = vand.u32 4294901760, %v160_v46  ;;  %v777_v54 = vand.u32 4294901760, %v159_v52  ;;  %v153_v28 = vld [vmem:[#allocation5 + $0x10] sm:$0xff] }
  0x13   :  { %v211_v15 = vsub.f32 %v714_v10, %v210_v13  ;;  %v746_v38 = vsub.f32 %v163_v31, %v736_v34  ;;  %v758_v44 = vsub.f32 %v162_v35, %v748_v39  ;;  %v771_v50 = vsub.f32 %v161_v40, %v762_v45 }
  0x14   :  { %v216_v32 = vand.u32 4294901760, %v726_v29  ;;  %172 = vmatpush.msra.mxu0 %v728_v30  ;;  %314 = vmatpush.msra.mxu2 %v726_v29  ;;  %v222_v37 = vand.u32 4294901760, %v734_v33  ;;  %v784_v57 = vsub.f32 %v160_v46, %v773_v51  ;;  %v789_v59 = vsub.f32 %v159_v52, %v777_v54 }
  0x15   :  { %v212_v16 = vand.u32 4294901760, %v211_v15  ;;  %368 = vmatpush.msra.mxu3 %v728_v30  ;;  %v228_v43 = vand.u32 4294901760, %v746_v38  ;;  %v234_v49 = vand.u32 4294901760, %v758_v44  ;;  %v240_v56 = vand.u32 4294901760, %v771_v50  ;;  %v155_v15 = vld [vmem:[#allocation5 + $0x20] sm:$0xff] }
  0x16   :  { %574 = vset.pattern.permute.xlu1 %v676_v5  ;;  %572 = vset.pattern.permute.xlu0 %v677_v6  ;;  %v217_v36 = vsub.f32 %v726_v29, %v216_v32  ;;  %v223_v42 = vsub.f32 %v734_v33, %v222_v37  ;;  %v791_v60 = vand.u32 4294901760, %v158_v58  ;;  %v246_v63 = vand.u32 4294901760, %v784_v57  ;;  %v156_v6 = vld [vmem:[#allocation5 + $0x28] sm:$0xff] }
  0x17   :  { %70 = vperm.xlu1 %574, %v45_v4   ;;  %56 = vperm.xlu0 %572, %v45_v4   ;;  %v229_v48 = vsub.f32 %v746_v38, %v228_v43  ;;  %v235_v55 = vsub.f32 %v758_v44, %v234_v49  ;;  %v241_v62 = vsub.f32 %v771_v50, %v240_v56  ;;  %v252_v1 = vand.u32 4294901760, %v789_v59 }
  0x18   :  { %576 = vset.pattern.permute.xlu2 %v678_v7  ;;  %213 = vmatpush.msra.mxu1 %v212_v16  ;;  %v218_v41 = vand.u32 4294901760, %v217_v36  ;;  %v224_v47 = vand.u32 4294901760, %v223_v42  ;;  %v802_v2 = vsub.f32 %v158_v58, %v791_v60  ;;  %v804_v3 = vand.u32 4294901760, %v157_v0  ;;  %v152_v42 = vld [vmem:[#allocation5 + $0x8] sm:$0xff] }
  0x19   :  { %84 = vperm.xlu2 %576, %v45_v4   ;;  %174 = vmatpush.msra.mxu0 %v736_v34  ;;  %v230_v53 = vand.u32 4294901760, %v229_v48  ;;  %v236_v61 = vand.u32 4294901760, %v235_v55  ;;  %v247_v5 = vsub.f32 %v784_v57, %v246_v63  ;;  %v253_v7 = vsub.f32 %v789_v59, %v252_v1  ;;  %v151_v55 = vld [vmem:[#allocation5] sm:$0xff] }
  0x1a   :  { %317 = vmatpush.msra.mxu2 %v734_v33  ;;  %370 = vmatpush.msra.mxu3 %v736_v34  ;;  %v258_v8 = vand.u32 4294901760, %v802_v2  ;;  %v848_v36 = vand.u32 4294901760, %v153_v28  ;;  %v865_v48 = vand.u32 4294901760, %v152_v42  ;;  %v43_v10 = vlaneseq }
  0x1b   :  { %176 = vmatpush.msra.mxu0 %v748_v39  ;;  %219 = vmatpush.msra.mxu1 %v218_v41  ;;  %v254_v16 = vand.u32 4294901760, %v253_v7 }
  0x1c   :  { %320 = vmatpush.msra.mxu2 %v746_v38  ;;  %372 = vmatpush.msra.mxu3 %v748_v39  ;;  %v915_v33 = vand.u32 127, %v43_v10 }
  0x1d   :  { %178 = vmatpush.msra.mxu0 %v762_v45  ;;  %225 = vmatpush.msra.mxu1 %v224_v47  ;;  %v863_v47 = vsub.f32 %v153_v28, %v848_v36 }
  0x1e   :  { %323 = vmatpush.msra.mxu2 %v758_v44  ;;  %374 = vmatpush.msra.mxu3 %v762_v45  ;;  %vm46_vm0 = vcmp.eq.s32.totalorder %v915_v33, 0  ;;  %vm54_vm1 = vcmp.eq.s32.totalorder %v915_v33, 1  ;;  %vm61_vm2 = vcmp.eq.s32.totalorder %v915_v33, 2  ;;  %vm68_vm3 = vcmp.eq.s32.totalorder %v915_v33, 3 }
  0x1f   :  { %577 = vset.pattern.permute.xlu1 %v679_v11  ;;  %579 = vset.pattern.permute.xlu0 %v680_v12  ;;  %v816_v11 = vsub.f32 %v157_v0, %v804_v3  ;;  %v248_v12 = vand.u32 4294901760, %v247_v5  ;;  %v875_v0 = vand.u32 4294901760, %v151_v55  ;;  %vm75_vm4 = vcmp.eq.s32.totalorder %v915_v33, 4 }
  0x20   :  { %91 = vperm.xlu1 %577, %v45_v4   ;;  %105 = vperm.xlu0 %579, %v45_v4   ;;  %vm82_vm5 = vcmp.eq.s32.totalorder %v915_v33, 5  ;;  %vm89_vm6 = vcmp.eq.s32.totalorder %v915_v33, 6  ;;  %vm96_vm7 = vcmp.eq.s32.totalorder %v915_v33, 7  ;;  %vm103_vm8 = vcmp.eq.s32.totalorder %v915_v33, 8 }
  0x21   :  { %578 = vset.pattern.permute.xlu2 %v681_v14  ;;  %180 = vmatpush.msra.mxu0 %v773_v51  ;;  %v820_v14 = vand.u32 4294901760, %v156_v6  ;;  %v888_v7 = vsub.f32 %v151_v55, %v875_v0  ;;  %vm110_vm9 = vcmp.eq.s32.totalorder %v915_v33, 9  ;;  %vm117_vm10 = vcmp.eq.s32.totalorder %v915_v33, 10 }
  0x22   :  { %98 = vperm.xlu2 %578, %v45_v4   ;;  %326 = vmatpush.msra.mxu2 %v771_v50  ;;  %vm124_vm11 = vcmp.eq.s32.totalorder %v915_v33, 11 }
  0x23   :  { %231 = vmatpush.msra.mxu1 %v230_v53  ;;  %376 = vmatpush.msra.mxu3 %v773_v51 }
  0x24   :  { %182 = vmatpush.msra.mxu0 %v777_v54  ;;  %329 = vmatpush.msra.mxu2 %v784_v57 }
  0x25   :  { %378 = vmatpush.msra.mxu3 %v777_v54  ;;  %237 = vmatpush.msra.mxu1 %v236_v61  ;;  %v288_v61 = vand.u32 4294901760, %v863_v47 }
  0x26   :  { %184 = vmatpush.msra.mxu0 %v791_v60  ;;  %332 = vmatpush.msra.mxu2 %v789_v59 }
  0x27   :  { %380 = vmatpush.msra.mxu3 %v791_v60  ;;  %v289_v5 = vsub.f32 %v863_v47, %v288_v61 }
  0x28   :  { %580 = vset.pattern.permute.xlu1 %v682_v17  ;;  %584 = vset.pattern.permute.xlu0 %v683_v18  ;;  %v259_v17 = vsub.f32 %v802_v2, %v258_v8  ;;  %v264_v18 = vand.u32 4294901760, %v816_v11 }
  0x29   :  { %112 = vperm.xlu1 %580, %v45_v4   ;;  %126 = vperm.xlu0 %584, %v45_v4  }
  0x2a   :  { %581 = vset.pattern.permute.xlu2 %v684_v19  ;;  %186 = vmatpush.msra.mxu0 %v804_v3  ;;  %v827_v19 = vand.u32 4294901760, %v155_v15 }
  0x2b   :  { %119 = vperm.xlu2 %581, %v45_v4   ;;  %v242_v4 = vand.u32 4294901760, %v241_v62  ;;  %335 = vmatpush.msra.mxu2 %v802_v2  ;;  %v873_v62 = vsub.f32 %v152_v42, %v865_v48 }
  0x2c   :  { %382 = vmatpush.msra.mxu3 %v804_v3  ;;  %188 = vmatpush.msra.mxu0 %v820_v14 }
  0x2d   :  { %243 = vmatpush.msra.mxu1 %v242_v4  ;;  %338 = vmatpush.msra.mxu2 %v816_v11 }
  0x2e   :  { %384 = vmatpush.msra.mxu3 %v820_v14  ;;  %190 = vmatpush.msra.mxu0 %v827_v19 }
  0x2f   :  { %249 = vmatpush.msra.mxu1 %v248_v12 }
  0x30   :  { %386 = vmatpush.msra.mxu3 %v827_v19 }
  0x31   :  { %582 = vset.pattern.permute.xlu1 %v685_v22  ;;  %586 = vset.pattern.permute.xlu0 %v686_v23  ;;  %v260_v22 = vand.u32 4294901760, %v259_v17  ;;  %v300_v17 = vand.u32 4294901760, %v888_v7 }
  0x32   :  { %135 = vperm.xlu1 %582, %v131_v20   ;;  %v832_v20 = vsub.f32 %v156_v6, %v820_v14  ;;  %255 = vmatpush.msra.mxu1 %v254_v16  ;;  %v294_v6 = vand.u32 4294901760, %v873_v62 }
  0x33   :  { %583 = vset.pattern.permute.xlu2 %v687_v24  ;;  %v839_v24 = vsub.f32 %v155_v15, %v827_v19  ;;  %v290_v15 = vand.u32 4294901760, %v289_v5 }
  0x34   :  { %139 = vperm.xlu2 %583, %v132_v21   ;;  %v154_v21 = vld [vmem:[#allocation5 + $0x18] sm:$0xff]  ;;  %341 = vmatpush.msra.mxu2 %v832_v20  ;;  %v295_v16 = vsub.f32 %v873_v62, %v294_v6 }
  0x35   :  { %v844_v26 = vand.u32 4294901760, %v154_v21  ;;  %v276_v35 = vand.u32 4294901760, %v839_v24  ;;  %261 = vmatpush.msra.mxu1 %v260_v22  ;;  %v301_v22 = vsub.f32 %v888_v7, %v300_v17 }
  0x36   :  { %344 = vmatpush.msra.mxu2 %v839_v24 }
  0x37   :  { %v856_v41 = vsub.f32 %v154_v21, %v844_v26  ;;  %192 = vmatpush.msra.mxu0 %v844_v26  ;;  %v277_v46 = vsub.f32 %v839_v24, %v276_v35  ;;  %388 = vmatpush.msra.mxu3 %v844_v26  ;;  %v296_v21 = vand.u32 4294901760, %v295_v16 }
  0x39   :  { %v282_v53 = vand.u32 4294901760, %v856_v41  ;;  %194 = vmatpush.msra.mxu0 %v848_v36  ;;  %v278_v58 = vand.u32 4294901760, %v277_v46  ;;  %347 = vmatpush.msra.mxu2 %v856_v41 }
  0x3a   :  { %585 = vset.pattern.permute.xlu1 %v686_v23  ;;  %v265_v23 = vsub.f32 %v816_v11, %v264_v18  ;;  %390 = vmatpush.msra.mxu3 %v848_v36 }
  0x3b   :  { %144 = vperm.xlu1 %585, %v133_v25   ;;  %v270_v25 = vand.u32 4294901760, %v832_v20  ;;  %v283_v4 = vsub.f32 %v856_v41, %v282_v53  ;;  %196 = vmatpush.msra.mxu0 %v865_v48 }
  0x3c   :  { %v266_v31 = vand.u32 4294901760, %v265_v23  ;;  %350 = vmatpush.msra.mxu2 %v863_v47  ;;  %392 = vmatpush.msra.mxu3 %v865_v48  ;;  %v302_v23 = vand.u32 4294901760, %v301_v22 }
  0x3d   :  { %v271_v40 = vsub.f32 %v832_v20, %v270_v25  ;;  %v284_v12 = vand.u32 4294901760, %v283_v4  ;;  %198 = vmatpush.msra.mxu0 %v875_v0 }
  0x3e   :  { %267 = vmatpush.msra.mxu1 %v266_v31  ;;  %353 = vmatpush.msra.mxu2 %v873_v62 }
  0x3f   :  { %v272_v52 = vand.u32 4294901760, %v271_v40  ;;  %405 = vmatpush.msrb.mxu0 %v210_v13  ;;  %394 = vmatpush.msra.mxu3 %v875_v0  ;;  %v688_v40 = vmov 0.0  }
  0x40   :  { %356 = vmatpush.msra.mxu2 %v888_v7 }
  0x41   :  { %273 = vmatpush.msra.mxu1 %v272_v52  ;;  %409 = vmatpush.msrb.mxu0 %v216_v32 }
  0x43   :  { %279 = vmatpush.msra.mxu1 %v278_v58  ;;  %413 = vmatpush.msrb.mxu0 %v222_v37 }
  0x45   :  { %285 = vmatpush.msra.mxu1 %v284_v12  ;;  %417 = vmatpush.msrb.mxu0 %v228_v43 }
  0x47   :  { %291 = vmatpush.msra.mxu1 %v290_v15  ;;  %421 = vmatpush.msrb.mxu0 %v234_v49 }
  0x49   :  { %297 = vmatpush.msra.mxu1 %v296_v21  ;;  %425 = vmatpush.msrb.mxu0 %v240_v56 }
  0x4b   :  { %303 = vmatpush.msra.mxu1 %v302_v23  ;;  %429 = vmatpush.msrb.mxu0 %v246_v63 }
  0x4d   :  { %472 = vmatpush.msrb.mxu1 %v711_v9  ;;  %433 = vmatpush.msrb.mxu0 %v252_v1 }
  0x4f   :  { %474 = vmatpush.msrb.mxu1 %v723_v27  ;;  %437 = vmatpush.msrb.mxu0 %v258_v8 }
  0x51   :  { %476 = vmatpush.msrb.mxu1 %v728_v30  ;;  %441 = vmatpush.msrb.mxu0 %v264_v18 }
  0x53   :  { %478 = vmatpush.msrb.mxu1 %v736_v34  ;;  %445 = vmatpush.msrb.mxu0 %v270_v25 }
  0x55   :  { %480 = vmatpush.msrb.mxu1 %v748_v39  ;;  %449 = vmatpush.msrb.mxu0 %v276_v35 }
  0x57   :  { %482 = vmatpush.msrb.mxu1 %v762_v45  ;;  %453 = vmatpush.msrb.mxu0 %v282_v53 }
  0x59   :  { %484 = vmatpush.msrb.mxu1 %v773_v51  ;;  %457 = vmatpush.msrb.mxu0 %v288_v61 }
  0x5b   :  { %486 = vmatpush.msrb.mxu1 %v777_v54  ;;  %461 = vmatpush.msrb.mxu0 %v294_v6 }
  0x5d   :  { %488 = vmatpush.msrb.mxu1 %v791_v60  ;;  %465 = vmatpush.msrb.mxu0 %v300_v17 }
  0x5f   :  { %490 = vmatpush.msrb.mxu1 %v804_v3 }
  0x61   :  { %492 = vmatpush.msrb.mxu1 %v820_v14 }
  0x63   :  { %494 = vmatpush.msrb.mxu1 %v827_v19 }
  0x65   :  { %496 = vmatpush.msrb.mxu1 %v844_v26 }
  0x67   :  { %498 = vmatpush.msrb.mxu1 %v848_v36 }
  0x69   :  { %v78_v13 = vpop.permute.xlu2 %77  ;;  %500 = vmatpush.msrb.mxu1 %v865_v48 }
  0x6a   :  { %v80_v50 = vsel %vm75_vm4, %v78_v13, 0.0 }
  0x6b   :  { %502 = vmatpush.msrb.mxu1 %v875_v0 }
  0x73   :  { %v85_v37 = vpop.permute.xlu2 %84 }
  0x74   :  { %v87_v56 = vsel %vm82_vm5, %v85_v37, 0.0 }
  0x7c   :  { %v99_v51 = vpop.permute.xlu2 %98 }
  0x7d   :  { %v101_v1 = vsel %vm96_vm7, %v99_v51, 0.0 }
  0x80   :  { %v64_v29 = vpop.permute.xlu1 %63  ;;  %v50_v32 = vpop.permute.xlu0 %49 }
  0x81   :  { %v52_v9 = vsel %vm46_vm0, %v50_v32, 0.0  ;;  %v66_v39 = vsel %vm61_vm2, %v64_v29, 0.0 }
  0x85   :  { %v120_v2 = vpop.permute.xlu2 %119 }
  0x86   :  { %v122_v24 = vsel %vm117_vm10, %v120_v2, 0.0 }
  0x89   :  { %v71_v27 = vpop.permute.xlu1 %70  ;;  %v57_v30 = vpop.permute.xlu0 %56 }
  0x8a   :  { %v59_v34 = vsel %vm54_vm1, %v57_v30, 0.0  ;;  %v73_v44 = vsel %vm68_vm3, %v71_v27, 0.0  ;;  %vm508_vm3 = vcmp.lt.s32.totalorder %v915_v33, 16 }
  0x8b   :  { %v60_v38 = vadd.f32 %v59_v34, %v52_v9 }
  0x8d   :  { %v67_v43 = vadd.f32 %v66_v39, %v60_v38 }
  0x8e   :  { %v140_v25 = vpop.permute.xlu2 %139 }
  0x8f   :  { %v74_v45 = vadd.f32 %v73_v44, %v67_v43  ;;  %vm141_vm12 = vcmp.eq.s32.totalorder %v915_v33, %v140_v25 }
  0x91   :  { %v81_v54 = vadd.f32 %v80_v50, %v74_v45 }
  0x92   :  { %v92_v49 = vpop.permute.xlu1 %91  ;;  %v106_v3 = vpop.permute.xlu0 %105 }
  0x93   :  { %v88_v57 = vadd.f32 %v87_v56, %v81_v54  ;;  %v94_v59 = vsel %vm89_vm6, %v92_v49, 0.0  ;;  %v108_v11 = vsel %vm103_vm8, %v106_v3, 0.0 }
  0x95   :  { %v95_v63 = vadd.f32 %v94_v59, %v88_v57 }
  0x97   :  { %v102_v8 = vadd.f32 %v101_v1, %v95_v63 }
  0x99   :  { %v109_v19 = vadd.f32 %v108_v11, %v102_v8 }
  0x9b   :  { %v113_v60 = vpop.permute.xlu1 %112  ;;  %v127_v26 = vpop.permute.xlu0 %126 }
  0x9c   :  { %v115_v14 = vsel %vm110_vm9, %v113_v60, 0.0  ;;  %v129_v31 = vsel %vm124_vm11, %v127_v26, 0.0 }
  0x9d   :  { %v116_v20 = vadd.f32 %v115_v14, %v109_v19 }
  0x9f   :  { %v123_v28 = vadd.f32 %v122_v24, %v116_v20 }
  0xa1   :  { %v130_v36 = vadd.f32 %v129_v31, %v123_v28 }
  0xa4   :  { %v136_v18 = vpop.permute.xlu1 %135 }
  0xa5   :  { %vm137_vm13 = vcmp.eq.s32.totalorder %v915_v33, %v136_v18 }
  0xa6   :  { %vm142_vm14 = vmor %vm137_vm13, %vm141_vm12 }
  0xad   :  { %v145_v35 = vpop.permute.xlu1 %144 }
  0xae   :  { %vm146_vm15 = vcmp.eq.s32.totalorder %v915_v33, %v145_v35 }
  0xaf   :  { %vm147_vm0 = vmor %vm142_vm14, %vm146_vm15 }
  0xb0   :  { %v548_v41 = vsel %vm147_vm0, 1.0, %v688_v40 }
  0xb1   :  { %v150_v42 = vadd.f32 %v548_v41, %v130_v36 }
  0xb3   :  { %v199_v46 = vand.u32 4294901760, %v150_v42 }
  0xb5   :  { %305 = vmatmul.f32.vlgmr.msra.gmra.mxu1 %v199_v46  ;;  %v200_v47 = vsub.f32 %v150_v42, %v199_v46 }
  0xb7   :  { %359 = vmatmul.f32.vlgmr.msra.gmra.mxu2 %v200_v47  ;;  %v201_v48 = vand.u32 4294901760, %v200_v47 }
  0xb9   :  { %398 = vmatmul.f32.vlgmr.msra.gmra.mxu3 %v201_v48  ;;  %v202_v52 = vsub.f32 %v200_v47, %v201_v48 }
  0xbb   :  { %v203_v53 = vand.u32 4294901760, %v202_v52 }
  0xbd   :  { %204 = vmatmul.f32.vlgmr.msra.gmra.mxu0 %v203_v53  ;;  %504 = vmatmul.f32.vlgmr.msrb.gmra.mxu1 %v199_v46 }
  0xc5   :  { %467 = vmatmul.f32.vlgmr.msrb.gmra.mxu0 %v199_v46 }
 0x132   :  { %v306_v55 = vpop.f32.mrf.mxu1 }
 0x13a   :  { %v205_v58 = vpop.f32.mrf.mxu0  ;;  %v360_v62 = vpop.f32.mrf.mxu2 }
 0x13b   :  { %v307_v61 = vadd.f32 %v306_v55, %v205_v58  ;;  %v505_v12 = vpop.f32.mrf.mxu1 }
 0x13c   :  { %v399_v4 = vpop.f32.mrf.mxu3 }
 0x13d   :  { %v361_v0 = vadd.f32 %v360_v62, %v307_v61 }
 0x13f   :  { %v400_v5 = vadd.f32 %v399_v4, %v361_v0 }
 0x142   :  { %v468_v6 = vpop.f32.mrf.mxu0 }
 0x143   :  { %v469_v7 = vadd.f32 %v468_v6, %v400_v5 }
 0x145   :  { %v506_v15 = vadd.f32 %v505_v12, %v469_v7 }
 0x147   :  { %v549_v16 = vmul.f32 -1.442695, %v506_v15 }
 0x149   :  { %587 = vpow2.f32 %v549_v16 }
 0x14f   :  { %v588_v17 = vpop.eup %587 }
 0x150   :  { %v512_v21 = vadd.f32 1.0, %v588_v17 }
 0x152   :  { %589 = vrcp.f32 %v512_v21  ;;  %v524_v13 = vand.u32 2147483648, %v512_v21  ;;  %v522_v32 = vand.u32 2147483647, %v512_v21  ;;  %vm518_vm2 = vweird.f32 %v512_v21 }
 0x154   :  { %v525_v27 = vor.u32 1.1754944e-38, %v524_v13  ;;  %vm523_vm5 = vcmp.eq.f32.partialorder %v522_v32, 8.507059e+37 }
 0x158   :  { %v590_v22 = vpop.eup %589 }
 0x159   :  { %v514_v23 = vmul.f32 %v590_v22, %v512_v21  ;;  %vm519_vm1 = vweird.f32 %v590_v22 }
 0x15a   :  { %vm520_vm4 = vmor %vm518_vm2, %vm519_vm1 }
 0x15b   :  { %v515_v10 = vsub.f32 1.0, %v514_v23 }
 0x15d   :  { %v516_v29 = vmul.f32 %v590_v22, %v515_v10 }
 0x15f   :  { %v517_v9 = vadd.f32 %v590_v22, %v516_v29 }
 0x161   :  { %v521_v30 = vsel %vm520_vm4, %v590_v22, %v517_v9 }
 0x162   :  { %v526_v34 = vsel %vm523_vm5, %v525_v27, %v521_v30 }
 0x163   :  { %v528_v37 = vsel %vm508_vm3, %v526_v34, %v506_v15 }
 0x164   :  { %529 = vst [vmem:[#allocation7] sm:$0xff] %v528_v37 }
 0x165   :  { %540 = dma.vmem_to_hbm [thread:$0]  %s536_s1, 128, %s538_s23, [#allocation4]  }
 0x166   :  { %667 = dma.done.wait [#allocation4], 128  }
 0x167   :  { %668 = vsyncadd [#allocation4], 4294967168 }
 0x168   :  { %545 = vsyncpa [#allocation3], 1 }
 0x169   :  { %546 = vsyncpa [#allocation6], 1 }
 0x16a   :  { %547 = vsyncpa [#allocation4], 1 }

</bundles_post_ra>
